<compile_context>
chip_gen: v7x
topology: tpu7x:2x2x1
jax: 0.10.0
libtpu: 0.0.40
codegen_flags: <defaults>
</compile_context>

<pallas_src>
import functools
import math

import jax
import jax.numpy as jnp
from jax.experimental import pallas as pl
from jax.experimental.pallas import tpu as pltpu


def _rope_math(x, cos, sin_s):
    """out = x*cos + partner(x)*sin_signed over the flattened (seq*d_k) lane axis.

    x:     (R, TN) activations, native dtype.
    cos:   (Rt, TN) f32, cos_k duplicated onto lanes 2k and 2k+1 (Rt in {1, R}).
    sin_s: (Rt, TN) f32, -sin_k on lane 2k, +sin_k on lane 2k+1.
    """
    tn = x.shape[-1]
    # Keep the rolls in the input dtype when it is 32-bit wide (avoids an extra
    # full-tile f32 temporary); otherwise upcast first.
    # TODO(synk): on v6e/v7x sub-32-bit rolls could stay packed to halve the
    # roll-temp traffic; kept conservative here for portability.
    xr = x if x.dtype.itemsize == 4 else x.astype(jnp.float32)
    x_next = pltpu.roll(xr, tn - 1, axis=1)      # result[l] = xr[l + 1]
    x_prev = pltpu.roll(xr, 1, axis=1)           # result[l] = xr[l - 1]
    lane = jax.lax.broadcasted_iota(jnp.int32, (1, tn), 1)   # (1, TN) — cheap mask
    partner = jnp.where((lane & 1) == 0, x_next, x_prev)
    return x.astype(jnp.float32) * cos + partner.astype(jnp.float32) * sin_s


def _rope_kernel_rows(x_ref, cos_ref, sin_ref, o_ref):
    # x_ref/o_ref: (TR, TN); cos_ref/sin_ref: (1, TN) shared over all rows.
    o_ref[...] = _rope_math(x_ref[...], cos_ref[...], sin_ref[...]).astype(o_ref.dtype)


def _rope_kernel_batched(x_ref, cos_ref, sin_ref, o_ref):
    # x_ref/o_ref: (1, H, TN); cos_ref/sin_ref: (1, 1, TN) per-batch tables.
    o_ref[0] = _rope_math(x_ref[0], cos_ref[0], sin_ref[0]).astype(o_ref.dtype)


def _rope_tables(pos, d_k, theta):
    """pos: (..., S) f32 -> (cos_full, sin_signed), each (..., S*d_k) lane-dense."""
    k = jnp.arange(d_k // 2, dtype=jnp.float32)
    inv_freq = 1.0 / (theta ** (2.0 * k / d_k))
    ang = pos[..., None] * inv_freq                              # (..., S, d_k//2)
    cos = jnp.cos(ang)
    sin = jnp.sin(ang)
    out_shape = pos.shape[:-1] + (pos.shape[-1] * d_k,)
    cos_full = jnp.repeat(cos, 2, axis=-1).reshape(out_shape)          # cos_k at 2k, 2k+1
    sin_signed = jnp.stack([-sin, sin], axis=-1).reshape(out_shape)    # -sin at 2k, +sin at 2k+1
    return cos_full, sin_signed


def _vmem_limit(block_bytes, table_bytes, rows, lanes):
    # double-buffered in/out + double-buffered tables + f32 temporaries
    est = 4 * block_bytes + 4 * table_bytes + 6 * rows * lanes * 4
    return int(min(max(2 * est, 32 << 20), 56 << 20))   # stay well under v7x's 64 MiB


def rotary_positional_embedding(x, token_positions, *, theta,
                                target_block_bytes=2 << 20):
    """RoPE forward. x: [..., heads, seq, d_k]; token_positions: [seq] or [..., seq]."""
    *lead, H, S, d_k = x.shape
    assert d_k % 2 == 0, "d_k must be even"
    B = math.prod(lead) if lead else 1
    SD = S * d_k
    xbytes = x.dtype.itemsize

    pos = jnp.asarray(token_positions)

    if pos.ndim <= 1:
        # ---------- Path A: positions shared across batch & heads ----------
        R = B * H
        x2 = x.reshape(R, SD)
        pos1 = jnp.broadcast_to(pos.astype(jnp.float32), (S,))
        cos_t, sin_t = _rope_tables(pos1, d_k, theta)        # (SD,), no batch dup
        cos_t = cos_t.reshape(1, SD)
        sin_t = sin_t.reshape(1, SD)

        # Lane tile: multiple of 128 (even => pairs never split) or full axis.
        max_lanes = max(128, (target_block_bytes // (8 * xbytes)) // 128 * 128)
        tn = SD if SD <= max_lanes else max_lanes
        # Row tile: multiple of 8 sublanes (or full axis), sized so the x block
        # is ~target_block_bytes.
        desired_tr = max(1, target_block_bytes // (tn * xbytes))
        tr = R if (desired_tr >= R or R < 8) else max(8, (desired_tr // 8) * 8)

        # Rows innermost => the (0, j) table block index is unchanged across the
        # inner loop and Pallas skips re-DMA of the tables.
        grid = (pl.cdiv(SD, tn), pl.cdiv(R, tr))
        vmem = _vmem_limit(tr * tn * xbytes, 2 * tn * 4, tr, tn)

        out2 = pl.pallas_call(
            _rope_kernel_rows,
            out_shape=jax.ShapeDtypeStruct((R, SD), x.dtype),
            grid_spec=pltpu.PrefetchScalarGridSpec(
                num_scalar_prefetch=0,
                grid=grid,
                in_specs=[
                    pl.BlockSpec((tr, tn), lambda j, i: (i, j)),   # x tile
                    pl.BlockSpec((1, tn), lambda j, i: (0, j)),    # cos (shared)
                    pl.BlockSpec((1, tn), lambda j, i: (0, j)),    # signed sin
                ],
                out_specs=pl.BlockSpec((tr, tn), lambda j, i: (i, j)),
            ),
            compiler_params=pltpu.CompilerParams(
                dimension_semantics=("parallel", "parallel"),
                vmem_limit_bytes=vmem),
        )(x2, cos_t, sin_t)
        return out2.reshape(*lead, H, S, d_k)

    # ---------- Path B: per-batch positions ----------
    # TODO(synk): per-batch positions keep one batch element per block (no
    # batch-folding for tiny S*d_k) and DMA per-batch tables; in-kernel EUP
    # sin/cos from an SMEM inv_freq row would shave the remaining table bytes.
    x3 = x.reshape(B, H, SD)
    pos_b = jnp.broadcast_to(pos, tuple(lead) + (S,)).reshape(B, S).astype(jnp.float32)
    cos_t, sin_t = _rope_tables(pos_b, d_k, theta)           # (B, SD)
    cos_t = cos_t.reshape(B, 1, SD)
    sin_t = sin_t.reshape(B, 1, SD)

    max_lanes = max(128, (target_block_bytes // (max(H, 1) * xbytes)) // 128 * 128)
    tn = SD if SD <= max_lanes else max_lanes
    grid = (B, pl.cdiv(SD, tn))
    vmem = _vmem_limit(H * tn * xbytes, 2 * tn * 4, H, tn)

    out3 = pl.pallas_call(
        _rope_kernel_batched,
        out_shape=jax.ShapeDtypeStruct((B, H, SD), x.dtype),
        grid_spec=pltpu.PrefetchScalarGridSpec(
            num_scalar_prefetch=0,
            grid=grid,
            in_specs=[
                pl.BlockSpec((1, H, tn), lambda b, j: (b, 0, j)),   # x tile
                pl.BlockSpec((1, 1, tn), lambda b, j: (b, 0, j)),   # cos (per batch)
                pl.BlockSpec((1, 1, tn), lambda b, j: (b, 0, j)),   # signed sin
            ],
            out_specs=pl.BlockSpec((1, H, tn), lambda b, j: (b, 0, j)),
        ),
        compiler_params=pltpu.CompilerParams(
            dimension_semantics=("parallel", "parallel"),
            vmem_limit_bytes=vmem),
    )(x3, cos_t, sin_t)
    return out3.reshape(*lead, H, S, d_k)


def _rope_reference(x, pos, theta):
    """Pure-JAX reference matching the PyTorch module. pos broadcastable to [..., S]."""
    d_k = x.shape[-1]
    k = jnp.arange(d_k // 2, dtype=jnp.float32)
    inv_freq = 1.0 / (theta ** (2.0 * k / d_k))
    ang = pos.astype(jnp.float32)[..., None] * inv_freq            # (..., S, d_k//2)
    cos, sin = jnp.cos(ang), jnp.sin(ang)
    xp = x.reshape(*x.shape[:-1], d_k // 2, 2)
    xe, xo = xp[..., 0], xp[..., 1]
    oe = cos * xe - sin * xo
    oo = sin * xe + cos * xo
    return jnp.stack([oe, oo], axis=-1).reshape(x.shape)


if __name__ == "__main__":
    key = jax.random.PRNGKey(0)
    batch, heads, seq, d_k = 2, 8, 8, 32
    theta = 10000.0
    # Positions stay below the module's max_seq_len (64 in the original tests).

    kx, _ = jax.random.split(key)
    x = jax.random.normal(kx, (batch, heads, seq, d_k), jnp.float32)

    rope_fn = jax.jit(functools.partial(rotary_positional_embedding, theta=theta))

    # Path A: shared 1-D token positions (the common case).
    token_positions = jnp.arange(seq, dtype=jnp.int32) + 3
    out = jax.block_until_ready(rope_fn(x, token_positions))
    ref = _rope_reference(x, token_positions, theta)
    assert out.shape == (batch, heads, seq, d_k)
    assert jnp.allclose(out, ref, atol=1e-5, rtol=1e-5)

    # Path B: per-batch token positions.
    pos_b = jnp.stack([jnp.arange(seq, dtype=jnp.int32),
                       jnp.arange(seq, dtype=jnp.int32) + 5])
    out_b = jax.block_until_ready(rope_fn(x, pos_b))
    ref_b = _rope_reference(x, pos_b[:, None, :], theta)
    assert jnp.allclose(out_b, ref_b, atol=1e-5, rtol=1e-5)

    print("KERNEL_OK")
</pallas_src>

<mosaic_0001>
module attributes {stable_mosaic.version = 11 : i64} {
  func.func @_rope_kernel_rows(%arg0: i32, %arg1: i32, %arg2: memref<16x256xf32, #tpu.memory_space<vmem>>, %arg3: memref<1x256xf32, #tpu.memory_space<vmem>>, %arg4: memref<1x256xf32, #tpu.memory_space<vmem>>, %arg5: memref<16x256xf32, #tpu.memory_space<vmem>>) attributes {dimension_semantics = [#tpu.dimension_semantics<parallel>, #tpu.dimension_semantics<parallel>], iteration_bounds = array<i64: 1, 1>, scalar_prefetch = 0 : i64, scratch_operands = 0 : i64, tpu.core_type = #tpu.core_type<tc>, window_params = [{transform_indices = @transform_0, window_bounds = array<i64: 16, 256>}, {transform_indices = @transform_1, window_bounds = array<i64: 1, 256>}, {transform_indices = @transform_2, window_bounds = array<i64: 1, 256>}, {transform_indices = @transform_3, window_bounds = array<i64: 16, 256>}]} {
    %c0 = arith.constant 0 : index
    %c0_0 = arith.constant 0 : index
    %0 = vector.load %arg2[%c0, %c0_0] : memref<16x256xf32, #tpu.memory_space<vmem>>, vector<16x256xf32>
    %c0_1 = arith.constant 0 : index
    %c0_2 = arith.constant 0 : index
    %1 = vector.load %arg3[%c0_1, %c0_2] : memref<1x256xf32, #tpu.memory_space<vmem>>, vector<1x256xf32>
    %c0_3 = arith.constant 0 : index
    %c0_4 = arith.constant 0 : index
    %2 = vector.load %arg4[%c0_3, %c0_4] : memref<1x256xf32, #tpu.memory_space<vmem>>, vector<1x256xf32>
    %c255_i32 = arith.constant 255 : i32
    %3 = tpu.dynamic_rotate %0 by %c255_i32 dim 1 : vector<16x256xf32>, i32 -> vector<16x256xf32>
    %c1_i32 = arith.constant 1 : i32
    %4 = tpu.dynamic_rotate %0 by %c1_i32 dim 1 : vector<16x256xf32>, i32 -> vector<16x256xf32>
    %5 = tpu.iota {dimensions = array<i32: 1>} : vector<1x256xi32>
    %c1_i32_5 = arith.constant 1 : i32
    %6 = vector.broadcast %c1_i32_5 : i32 to vector<1x256xi32>
    %7 = arith.andi %5, %6 : vector<1x256xi32>
    %c0_i32 = arith.constant 0 : i32
    %8 = vector.broadcast %c0_i32 : i32 to vector<1x256xi32>
    %9 = arith.cmpi eq, %7, %8 : vector<1x256xi32>
    %10 = vector.shape_cast %9 : vector<1x256xi1> to vector<1x256xi1>
    %11 = vector.broadcast %10 : vector<1x256xi1> to vector<16x256xi1>
    %12 = arith.select %11, %3, %4 : vector<16x256xi1>, vector<16x256xf32>
    %13 = vector.broadcast %1 : vector<1x256xf32> to vector<16x256xf32>
    %14 = arith.mulf %0, %13 : vector<16x256xf32>
    %15 = vector.broadcast %2 : vector<1x256xf32> to vector<16x256xf32>
    %16 = arith.mulf %12, %15 : vector<16x256xf32>
    %17 = arith.addf %14, %16 : vector<16x256xf32>
    %c0_6 = arith.constant 0 : index
    %c0_7 = arith.constant 0 : index
    %18 = vector.load %arg5[%c0_6, %c0_7] : memref<16x256xf32, #tpu.memory_space<vmem>>, vector<16x256xf32>
    tpu.vector_store %arg5[%c0_6, %c0_7], %17 {strides = array<i32>} : memref<16x256xf32, #tpu.memory_space<vmem>>, vector<16x256xf32>,
    return
  }
  func.func @transform_0(%arg0: i32, %arg1: i32) -> (i32, i32) {
    %c0_i32 = arith.constant 0 : i32
    return %arg1, %arg0 : i32, i32
  }
  func.func @transform_1(%arg0: i32, %arg1: i32) -> (i32, i32) {
    %c0_i32 = arith.constant 0 : i32
    %c0_i32_0 = arith.constant 0 : i32
    return %c0_i32, %arg0 : i32, i32
  }
  func.func @transform_2(%arg0: i32, %arg1: i32) -> (i32, i32) {
    %c0_i32 = arith.constant 0 : i32
    %c0_i32_0 = arith.constant 0 : i32
    return %c0_i32, %arg0 : i32, i32
  }
  func.func @transform_3(%arg0: i32, %arg1: i32) -> (i32, i32) {
    %c0_i32 = arith.constant 0 : i32
    return %arg1, %arg0 : i32, i32
  }
}

</mosaic_0001>

<bundles_post_ra>
// kernel: rotary_positional_embedding.1
= control target key start
LH: loop header
LB: loop body
LE: loop exit
PB: predicated region body
PF: predicated region fallthrough
CT: control target
= control target key end

     0   :  { %s105_s16 = smov 127   ;;  %s106_s21 = smov 1   ;;  %v28_v4 = vlaneseq  ;;  %s177_s0 = inlined_call_operand.vmem [shape: f32[16,256], index: 0, kind: input, shape index: {}]   ;;  %s178_s1 = inlined_call_operand.vmem [shape: f32[1,256], index: 1, kind: input, shape index: {}]   ;;  %s179_s2 = inlined_call_operand.vmem [shape: f32[1,256], index: 2, kind: input, shape index: {}]   ;;  %s180_s3 = inlined_call_operand.vmem [shape: f32[16,256], index: 3, kind: output, shape index: {}]  }
   0x1   :  { %v15_v0 = vld [vmem:[%s177_s0 + $0x8] sm:$0xff]  ;;  %v14_v1 = vld [vmem:[%s177_s0] sm:$0xff]  ;;  %v17_v2 = vld [vmem:[%s177_s0 + $0x18] sm:$0xff] }
   0x2   :  { %24 = vrot.lane.b32.xlu1 %v15_v0, %s105_s16  ;;  %20 = vrot.lane.b32.xlu0 %v14_v1, %s105_s16  ;;  %v16_v3 = vld [vmem:[%s177_s0 + $0x10] sm:$0xff]  ;;  %v63_v5 = vshrl.u32 %v28_v4, 7  ;;  %v29_v8 = vand.u32 127, %v28_v4  ;;  %v18_v10 = vld [vmem:[%s178_s1] sm:$0x3] }
   0x3   :  { %v19_v18 = vld [vmem:[%s179_s2] sm:$0x3] }
   0x4   :  { %v68_v9 = vsub.s32 1, %v63_v5  ;;  %v64_v11 = vsub.s32 0, %v63_v5  ;;  %v48_v12 = vadd.s32 128, %v29_v8  ;;  %v49_v16 = vand.u32 1, %v29_v8 }
   0x5   :  { %vm30_vm0 = vcmp.lt.s32.totalorder %v29_v8, 127  ;;  %vm43_vm1 = vcmp.lt.s32.totalorder %v29_v8, 1 }
   0x6   :  { %26 = vrot.lane.b32.xlu1 %v17_v2, %s105_s16  ;;  %22 = vrot.lane.b32.xlu0 %v16_v3, %s105_s16  ;;  %v69_v15 = vrot.slane %v18_v10, %v68_v9  ;;  %v65_v17 = vrot.slane %v18_v10, %v64_v11  ;;  %v50_v19 = vand.u32 1, %v48_v12  ;;  %vm145_vm2 = vcmp.eq.s32.totalorder %v49_v16, 0 }
   0x7   :  { %v80_v24 = vrot.slane %v19_v18, %v64_v11  ;;  %v84_v25 = vrot.slane %v19_v18, %v68_v9 }
   0x8   :  { %v73_v22 = vmul.f32 %v69_v15, %v15_v0  ;;  %v72_v26 = vmul.f32 %v65_v17, %v14_v1  ;;  %v75_v27 = vmul.f32 %v69_v15, %v17_v2  ;;  %v74_v28 = vmul.f32 %v65_v17, %v16_v3 }
   0x9   :  { %vm149_vm3 = vcmp.eq.s32.totalorder %v50_v19, 0 }
   0xa   :  { %37 = vrot.lane.b32.xlu1 %v16_v3, %s106_s21  ;;  %35 = vrot.lane.b32.xlu0 %v14_v1, %s106_s21 }
   0xe   :  { %41 = vrot.lane.b32.xlu1 %v17_v2, %s106_s21  ;;  %39 = vrot.lane.b32.xlu0 %v15_v0, %s106_s21 }
  0x74   :  { %v25_v6 = vpop.permute.xlu1 %24  ;;  %v21_v7 = vpop.permute.xlu0 %20 }
  0x75   :  { %v31_v30 = vsel %vm30_vm0, %v21_v7, %v25_v6  ;;  %v33_v31 = vsel %vm30_vm0, %v25_v6, %v21_v7 }
  0x78   :  { %v27_v13 = vpop.permute.xlu1 %26  ;;  %v23_v14 = vpop.permute.xlu0 %22 }
  0x79   :  { %v32_v32 = vsel %vm30_vm0, %v23_v14, %v27_v13  ;;  %v34_v33 = vsel %vm30_vm0, %v27_v13, %v23_v14 }
  0x7c   :  { %v38_v20 = vpop.permute.xlu1 %37  ;;  %v36_v21 = vpop.permute.xlu0 %35 }
  0x80   :  { %v42_v34 = vpop.permute.xlu1 %41  ;;  %v40_v35 = vpop.permute.xlu0 %39 }
  0x81   :  { %v45_v36 = vsel %vm43_vm1, %v38_v20, %v42_v34  ;;  %v47_v37 = vsel %vm43_vm1, %v42_v34, %v38_v20  ;;  %v44_v38 = vsel %vm43_vm1, %v36_v21, %v40_v35  ;;  %v46_v39 = vsel %vm43_vm1, %v40_v35, %v36_v21 }
  0x82   :  { %v59_v40 = vsel %vm145_vm2, %v32_v32, %v47_v37  ;;  %v60_v41 = vsel %vm149_vm3, %v34_v33, %v45_v36  ;;  %v57_v42 = vsel %vm145_vm2, %v31_v30, %v46_v39  ;;  %v58_v43 = vsel %vm149_vm3, %v33_v31, %v44_v38 }
  0x83   :  { %v89_v44 = vmul.f32 %v80_v24, %v59_v40  ;;  %v90_v45 = vmul.f32 %v84_v25, %v60_v41  ;;  %v87_v46 = vmul.f32 %v80_v24, %v57_v42  ;;  %v88_v47 = vmul.f32 %v84_v25, %v58_v43 }
  0x85   :  { %v93_v48 = vadd.f32 %v89_v44, %v74_v28  ;;  %v94_v49 = vadd.f32 %v90_v45, %v75_v27  ;;  %v91_v50 = vadd.f32 %v87_v46, %v72_v26  ;;  %v92_v51 = vadd.f32 %v88_v47, %v73_v22 }
  0x87   :  { %97 = vst [vmem:[%s180_s3 + $0x10] sm:$0xff] %v93_v48  ;;  %98 = vst [vmem:[%s180_s3 + $0x18] sm:$0xff] %v94_v49 }
  0x88   :  { %95 = vst [vmem:[%s180_s3] sm:$0xff] %v91_v50  ;;  %96 = vst [vmem:[%s180_s3 + $0x8] sm:$0xff] %v92_v51 }

</bundles_post_ra>
